<compile_context>
chip_gen: v7x
topology: tpu7x:2x2x1
jax: 0.10.0
libtpu: 0.0.40
codegen_flags: <defaults>
</compile_context>

<pallas_src>
import functools

import jax
import jax.numpy as jnp
from jax.experimental import pallas as pl
from jax.experimental.pallas import tpu as pltpu


def _round_up(x, m):
    return ((x + m - 1) // m) * m


def _batch_axis_semantics():
    """CORE_PARALLEL on v7x (2 TCs/chip); plain 'parallel' elsewhere."""
    try:
        kind = jax.devices()[0].device_kind.lower()
    except Exception:
        kind = ""
    if "v7" in kind:
        return (pltpu.CORE_PARALLEL,)
    return ("parallel",)


def categorical_kernel(x_ref, w_ref, b_ref, logits_ref, *, num_valid):
    """One batch tile: fused linear + log-softmax.

    x_ref:      (TB, K)      activations tile (f32 or bf16)
    w_ref:      (K, N_pad)   weights, pre-transposed + zero-padded to 128 lanes (resident)
    b_ref:      (1, N_pad)   bias, zero-padded (resident)
    logits_ref: (TB, N_pad)  normalized logits; padded lanes carry -1e30 sentinels
    """
    # Linear layer on the MXU with f32 accumulation.
    z = jnp.dot(x_ref[...], w_ref[...], preferred_element_type=jnp.float32) + b_ref[...]

    n_pad = z.shape[-1]
    if num_valid < n_pad:
        # Mask padded tail lanes so they cannot win the max / contribute to the sum.
        col = jax.lax.broadcasted_iota(jnp.int32, z.shape, 1)
        z = jnp.where(col < num_valid, z, jnp.float32(-1e30))

    # Numerically stable log-softmax over the lane axis.
    m = jnp.max(z, axis=-1, keepdims=True)
    e = jnp.exp(z - m)                      # padded lanes underflow to exactly 0
    s = jnp.sum(e, axis=-1, keepdims=True)

    # Single lane-dense (multiple-of-128) unmasked store.
    logits_ref[...] = (z - (m + jnp.log(s))).astype(logits_ref.dtype)


def prepare_params(w, b):
    """One-time parameter prep (hoisted out of the forward path).

    w: (num_outputs, num_inputs) -> (num_inputs, N_pad)   pre-transposed, lane-padded
    b: (num_outputs,)            -> (1, N_pad)            lane-padded
    """
    num_outputs, _ = w.shape
    n_pad = _round_up(num_outputs, 128)
    w_t = jnp.pad(w.T.astype(jnp.float32), ((0, 0), (0, n_pad - num_outputs)))
    b2d = jnp.pad(b.astype(jnp.float32), (0, n_pad - num_outputs)).reshape(1, n_pad)
    return w_t, b2d


def categorical_forward(x, w_t, b2d, num_outputs, *, block_rows=2048):
    """Fused forward of Categorical: returns (normalized_logits, probs).

    x:   (B, num_inputs)       activations (f32 or bf16; no wrapper-side cast/pad)
    w_t: (num_inputs, N_pad)   from prepare_params
    b2d: (1, N_pad)            from prepare_params
    """
    B, K = x.shape
    n_pad = w_t.shape[1]

    # Largest batch tile that covers B (ragged last tile handled by masked writeback).
    tb = min(block_rows, _round_up(B, 8))
    grid = (pl.cdiv(B, tb),)

    # Real VMEM footprint: double-buffered x + out tiles, single-copy resident W / bias,
    # plus ~2 MiB headroom.
    x_bytes = tb * K * x.dtype.itemsize
    out_bytes = tb * n_pad * 4
    wb_bytes = (K * n_pad + n_pad) * 4
    vmem_bytes = int(min(2 * (x_bytes + out_bytes) + 2 * wb_bytes + (2 << 20), 48 << 20))

    logits_pad = pl.pallas_call(
        functools.partial(categorical_kernel, num_valid=num_outputs),
        out_shape=jax.ShapeDtypeStruct((B, n_pad), jnp.float32),
        grid=grid,
        in_specs=[
            pl.BlockSpec((tb, K), lambda i: (i, 0)),        # batch-tiled activations
            pl.BlockSpec((K, n_pad), lambda i: (0, 0)),     # resident weights
            pl.BlockSpec((1, n_pad), lambda i: (0, 0)),     # resident bias
        ],
        out_specs=pl.BlockSpec((tb, n_pad), lambda i: (i, 0)),
        compiler_params=pltpu.CompilerParams(
            dimension_semantics=_batch_axis_semantics(),
            vmem_limit_bytes=vmem_bytes,
        ),
    )(x, w_t, b2d)

    logits = logits_pad[:, :num_outputs]
    # probs = exp(logits): exactly consistent with the logits and fused by XLA with the
    # slice above; no second output stream from the kernel.
    probs = jnp.exp(logits)
    return logits, probs


def make_params(key, num_inputs, num_outputs, gain=0.01):
    """Deterministic orthogonal init (gain=0.01) for W (num_outputs, num_inputs), zero bias."""
    a = jax.random.normal(key, (num_outputs, num_inputs), dtype=jnp.float32)
    if num_outputs <= num_inputs:
        q, r = jnp.linalg.qr(a.T)          # q: (num_inputs, num_outputs)
        d = jnp.sign(jnp.diag(r))
        w = (q * d).T                      # (num_outputs, num_inputs)
    else:
        q, r = jnp.linalg.qr(a)
        d = jnp.sign(jnp.diag(r))
        w = q * d
    w = gain * w
    b = jnp.zeros((num_outputs,), dtype=jnp.float32)
    return w, b


if __name__ == "__main__":
    key = jax.random.PRNGKey(0)
    k_x, k_w = jax.random.split(key)

    batch, num_inputs, num_outputs = 8, 32, 16
    x = jax.random.normal(k_x, (batch, num_inputs), dtype=jnp.float32)
    w, b = make_params(k_w, num_inputs, num_outputs)   # w: (num_outputs, num_inputs)

    # One-time parameter prep (hoisted out of the forward path).
    w_t, b2d = prepare_params(w, b)

    logits, probs = categorical_forward(x, w_t, b2d, num_outputs)
    jax.block_until_ready((logits, probs))

    # Pure-JAX reference.
    z_ref = x @ w.T + b
    logits_ref = z_ref - jax.nn.logsumexp(z_ref, axis=-1, keepdims=True)
    probs_ref = jax.nn.softmax(z_ref, axis=-1)
    assert logits.shape == (batch, num_outputs)
    assert probs.shape == (batch, num_outputs)
    assert jnp.allclose(logits, logits_ref, atol=1e-5), "logits mismatch"
    assert jnp.allclose(probs, probs_ref, atol=1e-5), "probs mismatch"
    assert jnp.allclose(jnp.sum(probs, axis=-1), 1.0, atol=1e-5), "probs not normalized"

    print("KERNEL_OK")
</pallas_src>

<mosaic_0001>
module attributes {stable_mosaic.version = 11 : i64} {
  func.func @categorical_kernel(%arg0: i32, %arg1: memref<8x32xf32, #tpu.memory_space<vmem>>, %arg2: memref<32x128xf32, #tpu.memory_space<vmem>>, %arg3: memref<1x128xf32, #tpu.memory_space<vmem>>, %arg4: memref<8x128xf32, #tpu.memory_space<vmem>>) attributes {dimension_semantics = [#tpu.dimension_semantics<parallel>], iteration_bounds = array<i64: 1>, scalar_prefetch = 0 : i64, scratch_operands = 0 : i64, tpu.core_type = #tpu.core_type<tc>, window_params = [{transform_indices = @transform_0, window_bounds = array<i64: 8, 32>}, {pipeline_mode = #tpu.pipeline_mode<synchronous>, transform_indices = @transform_1, window_bounds = array<i64: 32, 128>}, {pipeline_mode = #tpu.pipeline_mode<synchronous>, transform_indices = @transform_2, window_bounds = array<i64: 1, 128>}, {transform_indices = @transform_3, window_bounds = array<i64: 8, 128>}]} {
    %c0 = arith.constant 0 : index
    %c0_0 = arith.constant 0 : index
    %0 = vector.load %arg1[%c0, %c0_0] : memref<8x32xf32, #tpu.memory_space<vmem>>, vector<8x32xf32>
    %c0_1 = arith.constant 0 : index
    %c0_2 = arith.constant 0 : index
    %1 = vector.load %arg2[%c0_1, %c0_2] : memref<32x128xf32, #tpu.memory_space<vmem>>, vector<32x128xf32>
    %cst = arith.constant dense<0.000000e+00> : vector<8x128xf32>
    %2 = tpu.matmul %0, %1, %cst {dimension_numbers = #tpu.dot_dimension_numbers<[1], [0], [0], [1], [0, 0, 1, 1], [], []>} : vector<8x32xf32>, vector<32x128xf32>, vector<8x128xf32> -> vector<8x128xf32>
    %c0_3 = arith.constant 0 : index
    %c0_4 = arith.constant 0 : index
    %3 = vector.load %arg3[%c0_3, %c0_4] : memref<1x128xf32, #tpu.memory_space<vmem>>, vector<1x128xf32>
    %4 = vector.broadcast %3 : vector<1x128xf32> to vector<8x128xf32>
    %5 = arith.addf %2, %4 : vector<8x128xf32>
    %6 = tpu.iota {dimensions = array<i32: 1>} : vector<8x128xi32>
    %c16_i32 = arith.constant 16 : i32
    %7 = vector.broadcast %c16_i32 : i32 to vector<8x128xi32>
    %8 = arith.cmpi slt, %6, %7 : vector<8x128xi32>
    %cst_5 = arith.constant -1.000000e+30 : f32
    %9 = vector.broadcast %cst_5 : f32 to vector<8x128xf32>
    %10 = arith.select %8, %5, %9 : vector<8x128xi1>, vector<8x128xf32>
    %cst_6 = arith.constant dense<0xFF800000> : vector<8xf32>
    %11 = vector.multi_reduction <maximumf>, %10, %cst_6 [1] : vector<8x128xf32> to vector<8xf32>
    %12 = vector.shape_cast %11 : vector<8xf32> to vector<8x1xf32>
    %13 = vector.broadcast %12 : vector<8x1xf32> to vector<8x128xf32>
    %14 = arith.subf %10, %13 : vector<8x128xf32>
    %15 = math.exp %14 : vector<8x128xf32>
    %cst_7 = arith.constant dense<0.000000e+00> : vector<8xf32>
    %16 = vector.multi_reduction <add>, %15, %cst_7 [1] : vector<8x128xf32> to vector<8xf32>
    %17 = vector.shape_cast %16 : vector<8xf32> to vector<8x1xf32>
    %18 = math.log %17 : vector<8x1xf32>
    %19 = arith.addf %12, %18 : vector<8x1xf32>
    %20 = vector.broadcast %19 : vector<8x1xf32> to vector<8x128xf32>
    %21 = arith.subf %10, %20 : vector<8x128xf32>
    %c0_8 = arith.constant 0 : index
    %c0_9 = arith.constant 0 : index
    %22 = vector.load %arg4[%c0_8, %c0_9] : memref<8x128xf32, #tpu.memory_space<vmem>>, vector<8x128xf32>
    tpu.vector_store %arg4[%c0_8, %c0_9], %21 {strides = array<i32>} : memref<8x128xf32, #tpu.memory_space<vmem>>, vector<8x128xf32>,
    return
  }
  func.func @transform_0(%arg0: i32) -> (i32, i32) {
    %c0_i32 = arith.constant 0 : i32
    %c0_i32_0 = arith.constant 0 : i32
    return %arg0, %c0_i32 : i32, i32
  }
  func.func @transform_1(%arg0: i32) -> (i32, i32) {
    %c0_i32 = arith.constant 0 : i32
    %c0_i32_0 = arith.constant 0 : i32
    %c0_i32_1 = arith.constant 0 : i32
    return %c0_i32, %c0_i32_0 : i32, i32
  }
  func.func @transform_2(%arg0: i32) -> (i32, i32) {
    %c0_i32 = arith.constant 0 : i32
    %c0_i32_0 = arith.constant 0 : i32
    %c0_i32_1 = arith.constant 0 : i32
    return %c0_i32, %c0_i32_0 : i32, i32
  }
  func.func @transform_3(%arg0: i32) -> (i32, i32) {
    %c0_i32 = arith.constant 0 : i32
    %c0_i32_0 = arith.constant 0 : i32
    return %arg0, %c0_i32 : i32, i32
  }
}

</mosaic_0001>

<bundles_post_ra>
// kernel: tpu_custom_call.1
= control target key start
LH: loop header
LB: loop body
LE: loop exit
PB: predicated region body
PF: predicated region fallthrough
CT: control target
= control target key end

     0   :  { %8 = vsyncpa [#allocation3], 0  ;;  %s341_s0 = inlined_call_operand.hbm [shape: f32[8,32], index: 0, kind: input, shape index: {}]   ;;  %s342_s1 = inlined_call_operand.hbm [shape: f32[32,128], index: 1, kind: input, shape index: {}]   ;;  %s343_s2 = inlined_call_operand.vmem [shape: f32[1,128], index: 2, kind: input, shape index: {}]   ;;  %s344_s3 = inlined_call_operand.hbm [shape: f32[8,128], index: 3, kind: output, shape index: {}]  }
   0x1   :  { %9 = vsyncpa [#allocation6], 0 }
   0x2   :  { %10 = vsyncpa [#allocation4], 0  ;;  %s267_s12 = smov [#allocation2]   ;;  %s268_s14 = smov [#allocation5]  }
   0x3   :  { %s17_s13 = sshll.u32 %s267_s12, 4  ;;  %s26_s15 = sshll.u32 %s268_s14, 4  ;;  %s18_s13 = int_to_ptr.vmem [resolvable:$true] %s17_s13  ;;  %s295_s15 = int_to_ptr.vmem [resolvable:$true] %s26_s15 }
   0x4   :  { %s195_s18 = scalar_lea.hbm %s341_s0, 128 }
   0x5   :  { %p196_p0 = scmp.ne.s32.totalorder %s341_s0, %s195_s18  ;;  %p199_p1 = scmp.lt.u32.totalorder %s195_s18, %s341_s0 }
   0x7   :  { %p201_p2 = pnand %p199_p1, %p196_p0 }
   0x9   :  { %204 = shalt.err (!%p201_p2)
}
   0xa   :  { %s205_s23 = scalar_lea.vmem %s18_s13, 128  ;;  %p210_p4 = scmp.lt.s32.totalorder %s18_s13, %s18_s13 }
   0xb   :  { %p206_p3 = scmp.ne.s32.totalorder %s18_s13, %s205_s23  ;;  %p211_p5 = scmp.lt.s32.totalorder %s205_s23, %s205_s23 }
   0xd   :  { %p212_p6 = por %p211_p5, %p210_p4 }
   0xf   :  { %p213_p7 = pnand %p212_p6, %p206_p3 }
  0x11   :  { %216 = shalt.err (!%p213_p7)
}
  0x12   :  { %20 = dma.hbm_to_vmem [thread:$0]  %s341_s0, 128, %s18_s13, [#allocation3]  }
  0x13   :  { %s217_s28 = scalar_lea.hbm %s342_s1, 512 }
  0x14   :  { %p218_p8 = scmp.ne.s32.totalorder %s342_s1, %s217_s28  ;;  %p221_p9 = scmp.lt.u32.totalorder %s217_s28, %s342_s1 }
  0x16   :  { %p223_p10 = pnand %p221_p9, %p218_p8 }
  0x18   :  { %226 = shalt.err (!%p223_p10)
}
  0x19   :  { %s227_s6 = scalar_lea.vmem %s295_s15, 512  ;;  %p232_p12 = scmp.lt.s32.totalorder %s295_s15, %s295_s15 }
  0x1a   :  { %p228_p11 = scmp.ne.s32.totalorder %s295_s15, %s227_s6  ;;  %p233_p13 = scmp.lt.s32.totalorder %s227_s6, %s227_s6 }
  0x1c   :  { %p234_p0 = por %p233_p13, %p232_p12 }
  0x1e   :  { %p235_p1 = pnand %p234_p0, %p228_p11 }
  0x20   :  { %238 = shalt.err (!%p235_p1)
}
  0x21   :  { %s269_s0 = smov 128   ;;  %s270_s7 = smov 8  }
  0x22   :  { %32 = dma.hbm_to_vmem [thread:$0]  %s342_s1, 512, %s295_s15, [#allocation6], %s269_s0, %s269_s0, %s270_s7  }
  0x23   :  { %261 = dma.done.wait [#allocation3], 128  }
  0x24   :  { %262 = vsyncadd [#allocation3], 4294967168 }
  0x25   :  { %263 = dma.done.wait [#allocation6], 512  }
  0x26   :  { %264 = vsyncadd [#allocation6], 4294966784  ;;  %v271_v0 = vmov 0.0|0.0   ;;  %vm272_vm0 = vmmov 0   ;;  %v273_v1 = vmov 0.0   ;;  %v42_v2 = vld [vmem:[#allocation5] sm:$0xff]  ;;  %v127_v9 = vlaneseq }
  0x27   :  { %177 = vmatprep.subr.bf16.mxu0 %v271_v0  ;;  %174 = vmatprep.mubr.msk.f32.mxu0 %vm272_vm0, %v273_v1  ;;  %v43_v3 = vld [vmem:[#allocation5 + $0x8] sm:$0xff]  ;;  %v44_v4 = vld [vmem:[#allocation5 + $0x10] sm:$0xff]  ;;  %v45_v6 = vld [vmem:[#allocation5 + $0x18] sm:$0xff]  ;;  %vm53_vm1 = vcmask 261120   ;;  %s274_s11 = smov [#allocation7]  }
  0x28   :  { %v178_v5 = vpack.c.bf16 %v43_v3, %v42_v2  ;;  %v181_v7 = vpack.c.bf16 %v45_v6, %v44_v4  ;;  %v41_v8 = vld [vmem:[#allocation2] sm:$0xff]  ;;  %v128_v10 = vand.u32 127, %v127_v9  ;;  %s149_s12 = sshll.u32 %s274_s11, 4  ;;  %s150_s12 = int_to_ptr.vmem [resolvable:$true] %s149_s12 }
  0x29   :  { %v159_v11 = vld [vmem:[%s343_s2] ss:$0 sm:$0xff]  ;;  %s239_s2 = scalar_lea.vmem %s150_s12, 128  ;;  %p244_p3 = scmp.lt.s32.totalorder %s150_s12, %s150_s12 }
  0x2a   :  { %179 = vmatpush3.bf16.msra.mxu0 %v178_v5  ;;  %vm129_vm2 = vcmp.lt.s32.totalorder %v128_v10, 16  ;;  %p240_p2 = scmp.ne.s32.totalorder %s150_s12, %s239_s2  ;;  %p245_p4 = scmp.lt.s32.totalorder %s239_s2, %s239_s2 }
  0x2b   :  { %180 = vmatprep.subr.bf16.mxu0 %v271_v0 }
  0x2c   :  { %p246_p5 = por %p245_p4, %p244_p3 }
  0x2e   :  { %182 = vmatpush3.bf16.msra.mxu0 %v181_v7  ;;  %p247_p6 = pnand %p246_p5, %p240_p2 }
  0x31   :  { %175 = vmatmul.mubr.msk.f32.vlgmr.msra.gmra.mrb[0].mxu0 %vm53_vm1, %v41_v8 }
 0x104   :  { %v123_v12 = vpop.f32.mrb[0].mxu0 }
 0x105   :  { %v124_v13 = vadd.f32 %v159_v11, %v123_v12  ;;  %v176_v14 = vpop.f32.mrb[1].mxu0 }
 0x107   :  { %v130_v15 = vsel %vm129_vm2, %v124_v13, -1e+30 }
 0x108   :  { %131 = vmax.xlane.f32.xlu0 %v130_v15 }
 0x195   :  { %v132_v16 = vpop.xlane.xlu0 %131 }
 0x196   :  { %v133_v17 = vsub.f32 %v130_v15, %v132_v16 }
 0x198   :  { %v134_v18 = vmul.f32 1.442695, %v133_v17 }
 0x19a   :  { %191 = vpow2.f32 %v134_v18 }
 0x1a4   :  { %v192_v19 = vpop.eup %191 }
 0x1a5   :  { %136 = vadd.xlane.f32.xlu0 %v192_v19 }
 0x232   :  { %v137_v20 = vpop.xlane.xlu0 %136 }
 0x233   :  { %193 = vlog2.f32 %v137_v20 }
 0x23d   :  { %v194_v21 = vpop.eup %193 }
 0x23e   :  { %v139_v22 = vmul.f32 0.6931472, %v194_v21 }
 0x240   :  { %v140_v23 = vadd.f32 %v139_v22, %v132_v16 }
 0x242   :  { %v141_v24 = vsub.f32 %v130_v15, %v140_v23 }
 0x244   :  { %142 = vst [vmem:[#allocation7] sm:$0xff] %v141_v24 }
 0x245   :  { %250 = shalt.err (!%p247_p6)
}
 0x246   :  { %s251_s15 = scalar_lea.hbm %s344_s3, 128 }
 0x247   :  { %p252_p7 = scmp.ne.s32.totalorder %s344_s3, %s251_s15  ;;  %p255_p8 = scmp.lt.u32.totalorder %s251_s15, %s344_s3 }
 0x249   :  { %p257_p9 = pnand %p255_p8, %p252_p7 }
 0x24b   :  { %260 = shalt.err (!%p257_p9)
}
 0x24c   :  { %152 = dma.vmem_to_hbm [thread:$0]  %s150_s12, 128, %s344_s3, [#allocation4]  }
 0x24d   :  { %265 = dma.done.wait [#allocation4], 128  }
 0x24e   :  { %266 = vsyncadd [#allocation4], 4294967168 }
 0x24f   :  { %156 = vsyncpa [#allocation3], 1 }
 0x250   :  { %157 = vsyncpa [#allocation6], 1 }
 0x251   :  { %158 = vsyncpa [#allocation4], 1 }

</bundles_post_ra>
